<compile_context>
chip_gen: v6e
topology: v6e:2x2x1
jax: 0.10.0
libtpu: 0.0.40
codegen_flags: <defaults>
</compile_context>

<pallas_src>
from functools import lru_cache

import numpy as np
import jax
import jax.numpy as jnp
from jax.experimental import pallas as pl
from jax.experimental.pallas import tpu as pltpu


def _bilinear_weights_np(in_size: int, out_size: int) -> np.ndarray:
    """(out_size, in_size) row-stochastic matrix reproducing
    torch.nn.Upsample(mode='bilinear', align_corners=False) along one axis."""
    scale = in_size / out_size
    dst = np.arange(out_size, dtype=np.float64)
    src = np.maximum((dst + 0.5) * scale - 0.5, 0.0)      # PyTorch clamps negatives
    p0 = np.clip(np.floor(src).astype(np.int64), 0, in_size - 1)
    p1 = np.minimum(p0 + 1, in_size - 1)
    w1 = src - p0
    w0 = 1.0 - w1
    r = np.zeros((out_size, in_size), dtype=np.float64)
    r[np.arange(out_size), p0] += w0
    r[np.arange(out_size), p1] += w1                       # p0==p1 edge taps sum to 1
    return r


@lru_cache(maxsize=None)
def _interp_matrix(H: int, W: int, OH: int, OW: int, ohw_pad: int):
    """bf16 (H*W, ohw_pad) matrix RT[(p,q),(i,j)] = Rh[i,p]*Rw[j,q], zero-padded
    on the output columns.  Built once in numpy and cached as a device array."""
    rh = _bilinear_weights_np(H, OH)                       # (OH, H)
    rw = _bilinear_weights_np(W, OW)                       # (OW, W)
    rt = np.einsum('ip,jq->pqij', rh, rw).reshape(H * W, OH * OW)
    rt_pad = np.zeros((H * W, ohw_pad), dtype=np.float32)
    rt_pad[:, :OH * OW] = rt
    return jnp.asarray(rt_pad, dtype=jnp.bfloat16)


def _head_kernel(x_ref, wt_ref, rt_ref, out_ref):
    Bc, C, HW = x_ref.shape
    NCP = wt_ref.shape[0]
    OHWP = out_ref.shape[-1]
    # hidden is read from HBM once in its native dtype; cast to bf16 in-kernel.
    x = x_ref[...].astype(jnp.bfloat16)                            # (Bc, C, HW)
    # 1x1 conv == batched channel matmul on the MXU (bf16 in, f32 accumulate).
    wt_b = jnp.broadcast_to(wt_ref[...], (Bc, NCP, C))
    logits = jnp.einsum('bnc,bcs->bns', wt_b, x,
                        preferred_element_type=jnp.float32)        # (Bc, NCP, HW)
    # Merge batch into M (NCP % 8 == 0 -> sublane-aligned, free reshape).
    logits = logits.reshape(Bc * NCP, HW).astype(jnp.bfloat16)
    # Fused bilinear upsample: one lane-dense bf16 MXU matmul (N = 12 * 128).
    up = jnp.dot(logits, rt_ref[...], preferred_element_type=jnp.float32)
    out_ref[...] = up.reshape(Bc, NCP, OHWP)


def segformer_patch_classifier_head(hidden_nchw, conv_w, conv_b, out_hw=(38, 38),
                                    max_batch_chunk=16):
    """hidden_nchw: (B, C, H, W) encoder last_hidden_state; conv_w: (NC, C, 1, 1);
    conv_b: (NC,).  Returns logits (B, NC, 38, 38) float32."""
    B, C, H, W = hidden_nchw.shape
    NC = conv_w.shape[0]
    OH, OW = out_hw
    HW = H * W
    OHW = OH * OW
    OHW_pad = ((OHW + 127) // 128) * 128                   # lane-dense output cols
    NC_pad = ((NC + 7) // 8) * 8                           # sublane-aligned classes

    # Batch chunk: largest divisor of B that is <= max_batch_chunk.  Keeps the
    # fused-matmul M dim near the MXU row count and bounds per-step VMEM.
    Bc = min(B, max_batch_chunk)
    while B % Bc:
        Bc -= 1
    n_steps = B // Bc

    # Layout plumbing only: flatten spatial (free reshape), keep the dtype --
    # the bf16 cast happens inside the kernel so there is no extra HBM pass.
    x = hidden_nchw.reshape(B, C, HW)
    wt = jnp.zeros((NC_pad, C), jnp.bfloat16).at[:NC, :].set(
        conv_w[:, :, 0, 0].astype(jnp.bfloat16))
    rt = _interp_matrix(H, W, OH, OW, OHW_pad)             # cached bf16 constant

    flops = 2 * B * NC_pad * HW * (C + OHW_pad)
    bytes_accessed = int(x.size * x.dtype.itemsize + wt.size * 2 + rt.size * 2
                         + B * NC_pad * OHW_pad * 4)

    out_pad = pl.pallas_call(
        _head_kernel,
        out_shape=jax.ShapeDtypeStruct((B, NC_pad, OHW_pad), jnp.float32),
        grid=(n_steps,),
        in_specs=[
            pl.BlockSpec((Bc, C, HW), lambda i: (i, 0, 0)),        # hidden (native dtype)
            pl.BlockSpec((NC_pad, C), lambda i: (0, 0)),           # conv weight (bf16)
            pl.BlockSpec((HW, OHW_pad), lambda i: (0, 0)),         # interp matrix (bf16)
        ],
        out_specs=pl.BlockSpec((Bc, NC_pad, OHW_pad), lambda i: (i, 0, 0)),
        compiler_params=pltpu.CompilerParams(
            dimension_semantics=("parallel",)),
        cost_estimate=pl.CostEstimate(flops=flops, transcendentals=0,
                                      bytes_accessed=bytes_accessed),
    )(x, wt, rt)

    # Bias after the upsample (interp rows sum to 1, so bias is preserved);
    # added here so it fuses with the padding slice / reshape into the consumer.
    out = out_pad[:, :NC, :OHW] + conv_b.astype(jnp.float32)[None, :, None]
    return out.reshape(B, NC, OH, OW)


if __name__ == "__main__":
    key = jax.random.PRNGKey(0)
    k1, k2, k3 = jax.random.split(key, 3)

    # Small stand-in shapes: real SegFormer-b0 last_hidden_state is (B, 256, 16, 16).
    B, C, H, W = 2, 32, 8, 8
    NUM_CLASSES = 2

    # TODO(synk): the pretrained HuggingFace SegformerModel encoder cannot be
    # reproduced in-script (checkpoint load); we start from its last_hidden_state.
    hidden = jax.random.normal(k1, (B, C, H, W), dtype=jnp.float32)
    conv_w = jax.random.normal(k2, (NUM_CLASSES, C, 1, 1), dtype=jnp.float32) * 0.05
    conv_b = jax.random.normal(k3, (NUM_CLASSES,), dtype=jnp.float32) * 0.01

    out = segformer_patch_classifier_head(hidden, conv_w, conv_b)
    out = jax.block_until_ready(out)

    # Plain-JAX f32 reference (1x1 conv + bilinear upsample via interp matrices).
    rh = jnp.asarray(_bilinear_weights_np(H, 38), jnp.float32)
    rw = jnp.asarray(_bilinear_weights_np(W, 38), jnp.float32)
    logits_ref = (jnp.einsum('nc,bchw->bnhw', conv_w[:, :, 0, 0], hidden)
                  + conv_b[None, :, None, None])
    ref = jnp.einsum('ip,bnpq,jq->bnij', rh, logits_ref, rw)

    assert out.shape == (B, NUM_CLASSES, 38, 38), out.shape
    assert out.dtype == jnp.float32
    # Kernel uses bf16 weights / interp matrix and casts hidden to bf16 in-kernel
    # (f32 accumulation), so compare to the f32 reference with relaxed tolerance.
    assert jnp.allclose(out, ref, atol=2e-2, rtol=2e-2), \
        float(jnp.max(jnp.abs(out - ref)))
    print("KERNEL_OK")
</pallas_src>

<mosaic_0001>
module attributes {stable_mosaic.version = 11 : i64} {
  func.func @_head_kernel(%arg0: i32, %arg1: memref<2x32x64xf32, #tpu.memory_space<vmem>>, %arg2: memref<8x32xbf16, #tpu.memory_space<vmem>>, %arg3: memref<64x1536xbf16, #tpu.memory_space<vmem>>, %arg4: memref<2x8x1536xf32, #tpu.memory_space<vmem>>) attributes {dimension_semantics = [#tpu.dimension_semantics<parallel>], iteration_bounds = array<i64: 1>, scalar_prefetch = 0 : i64, scratch_operands = 0 : i64, tpu.core_type = #tpu.core_type<tc>, window_params = [{transform_indices = @transform_0, window_bounds = array<i64: 2, 32, 64>}, {pipeline_mode = #tpu.pipeline_mode<synchronous>, transform_indices = @transform_1, window_bounds = array<i64: 8, 32>}, {pipeline_mode = #tpu.pipeline_mode<synchronous>, transform_indices = @transform_2, window_bounds = array<i64: 64, 1536>}, {transform_indices = @transform_3, window_bounds = array<i64: 2, 8, 1536>}]} {
    %c0 = arith.constant 0 : index
    %c0_0 = arith.constant 0 : index
    %c0_1 = arith.constant 0 : index
    %0 = vector.load %arg1[%c0, %c0_0, %c0_1] : memref<2x32x64xf32, #tpu.memory_space<vmem>>, vector<2x32x64xf32>
    %1 = arith.truncf %0 : vector<2x32x64xf32> to vector<2x32x64xbf16>
    %c0_2 = arith.constant 0 : index
    %c0_3 = arith.constant 0 : index
    %2 = vector.load %arg2[%c0_2, %c0_3] : memref<8x32xbf16, #tpu.memory_space<vmem>>, vector<8x32xbf16>
    %3 = vector.shape_cast %2 : vector<8x32xbf16> to vector<1x8x32xbf16>
    %4 = vector.broadcast %3 : vector<1x8x32xbf16> to vector<2x8x32xbf16>
    "tpu.trace_start"() <{level = 10 : i32, message = "bnc,bcs->bns"}> : () -> ()
    %cst = arith.constant dense<0.000000e+00> : vector<2x8x64xf32>
    %5 = tpu.matmul %4, %1, %cst {dimension_numbers = #tpu.dot_dimension_numbers<[2], [1], [1], [2], [0, 0, 0, 1, 1, 2], [0], [0]>} : vector<2x8x32xbf16>, vector<2x32x64xbf16>, vector<2x8x64xf32> -> vector<2x8x64xf32>
    "tpu.trace_stop"() : () -> ()
    %6 = vector.shape_cast %5 : vector<2x8x64xf32> to vector<16x64xf32>
    %7 = arith.truncf %6 : vector<16x64xf32> to vector<16x64xbf16>
    %c0_4 = arith.constant 0 : index
    %c0_5 = arith.constant 0 : index
    %8 = vector.load %arg3[%c0_4, %c0_5] : memref<64x1536xbf16, #tpu.memory_space<vmem>>, vector<64x1536xbf16>
    %cst_6 = arith.constant dense<0.000000e+00> : vector<16x1536xf32>
    %9 = tpu.matmul %7, %8, %cst_6 {dimension_numbers = #tpu.dot_dimension_numbers<[1], [0], [0], [1], [0, 0, 1, 1], [], []>} : vector<16x64xbf16>, vector<64x1536xbf16>, vector<16x1536xf32> -> vector<16x1536xf32>
    %10 = vector.shape_cast %9 : vector<16x1536xf32> to vector<2x8x1536xf32>
    %c0_7 = arith.constant 0 : index
    %c0_8 = arith.constant 0 : index
    %c0_9 = arith.constant 0 : index
    %11 = vector.load %arg4[%c0_7, %c0_8, %c0_9] : memref<2x8x1536xf32, #tpu.memory_space<vmem>>, vector<2x8x1536xf32>
    tpu.vector_store %arg4[%c0_7, %c0_8, %c0_9], %10 {strides = array<i32>} : memref<2x8x1536xf32, #tpu.memory_space<vmem>>, vector<2x8x1536xf32>,
    return
  }
  func.func @transform_0(%arg0: i32) -> (i32, i32, i32) {
    %c0_i32 = arith.constant 0 : i32
    %c0_i32_0 = arith.constant 0 : i32
    %c0_i32_1 = arith.constant 0 : i32
    return %arg0, %c0_i32, %c0_i32_0 : i32, i32, i32
  }
  func.func @transform_1(%arg0: i32) -> (i32, i32) {
    %c0_i32 = arith.constant 0 : i32
    %c0_i32_0 = arith.constant 0 : i32
    %c0_i32_1 = arith.constant 0 : i32
    return %c0_i32, %c0_i32_0 : i32, i32
  }
  func.func @transform_2(%arg0: i32) -> (i32, i32) {
    %c0_i32 = arith.constant 0 : i32
    %c0_i32_0 = arith.constant 0 : i32
    %c0_i32_1 = arith.constant 0 : i32
    return %c0_i32, %c0_i32_0 : i32, i32
  }
  func.func @transform_3(%arg0: i32) -> (i32, i32, i32) {
    %c0_i32 = arith.constant 0 : i32
    %c0_i32_0 = arith.constant 0 : i32
    %c0_i32_1 = arith.constant 0 : i32
    return %arg0, %c0_i32, %c0_i32_0 : i32, i32, i32
  }
}

</mosaic_0001>

<bundles_post_ra>
// kernel: tpu_custom_call.1
= control target key start
LH: loop header
LB: loop body
LE: loop exit
PB: predicated region body
PF: predicated region fallthrough
CT: control target
= control target key end

     0   :  { %8 = vsyncpa [#allocation3], 0  ;;  %s1059_s0 = inlined_call_operand.hbm [shape: f32[2,32,64], index: 0, kind: input, shape index: {}]   ;;  %s1060_s1 = inlined_call_operand.hbm [shape: bf16[8,32], index: 1, kind: input, shape index: {}]   ;;  %s1061_s2 = inlined_call_operand.hbm [shape: bf16[64,1536], index: 2, kind: input, shape index: {}]   ;;  %s1062_s3 = inlined_call_operand.hbm [shape: f32[2,8,1536], index: 3, kind: output, shape index: {}]  }
   0x1   :  { %9 = vsyncpa [#allocation6], 0 }
   0x2   :  { %10 = vsyncpa [#allocation4], 0  ;;  %s994_s12 = smov [#allocation5]   ;;  %s995_s14 = smov [#allocation2]  }
   0x3   :  { %s29_s13 = sshll.u32 %s994_s12, 4  ;;  %s16_s15 = sshll.u32 %s995_s14, 4  ;;  %s30_s13 = int_to_ptr.vmem [resolvable:$true] %s29_s13  ;;  %s17_s15 = int_to_ptr.vmem [resolvable:$true] %s16_s15 }
   0x4   :  { %s916_s16 = scalar_lea.vmem %s30_s13, 64  ;;  %p921_p1 = scmp.lt.s32.totalorder %s30_s13, %s30_s13 }
   0x5   :  { %p917_p0 = scmp.ne.s32.totalorder %s30_s13, %s916_s16  ;;  %p922_p2 = scmp.lt.s32.totalorder %s916_s16, %s916_s16 }
   0x7   :  { %p923_p3 = por %p922_p2, %p921_p1 }
   0x9   :  { %p924_p4 = pnand %p923_p3, %p917_p0 }
   0xb   :  { %927 = shalt.err (!%p924_p4)
}
   0xc   :  { %32 = dma.hbm_to_vmem [thread:$0]  %s1060_s1, 64, %s30_s13, [#allocation6]  }
   0xd   :  { %s936_s19 = scalar_lea.vmem %s17_s15, 1024  ;;  %p941_p6 = scmp.lt.s32.totalorder %s17_s15, %s17_s15 }
   0xe   :  { %p937_p5 = scmp.ne.s32.totalorder %s17_s15, %s936_s19  ;;  %p942_p7 = scmp.lt.s32.totalorder %s936_s19, %s936_s19 }
  0x10   :  { %p943_p8 = por %p942_p7, %p941_p6 }
  0x12   :  { %p944_p9 = pnand %p943_p8, %p937_p5 }
  0x14   :  { %947 = shalt.err (!%p944_p9)
}
  0x15   :  { %s996_s20 = smov 128   ;;  %s997_s21 = smov 8  }
  0x16   :  { %22 = dma.hbm_to_vmem [thread:$0]  %s1059_s0, 1024, %s17_s15, [#allocation3], %s996_s20, %s996_s20, %s997_s21  }
  0x17   :  { %s998_s24 = smov [#allocation7]  }
  0x18   :  { %s38_s25 = sshll.u32 %s998_s24, 4  ;;  %s39_s25 = int_to_ptr.vmem [resolvable:$true] %s38_s25 }
  0x19   :  { %s956_s26 = scalar_lea.vmem %s39_s25, 6144  ;;  %p961_p11 = scmp.lt.s32.totalorder %s39_s25, %s39_s25 }
  0x1a   :  { %p957_p10 = scmp.ne.s32.totalorder %s39_s25, %s956_s26  ;;  %p962_p12 = scmp.lt.s32.totalorder %s956_s26, %s956_s26 }
  0x1c   :  { %p963_p13 = por %p962_p12, %p961_p11 }
  0x1e   :  { %p964_p0 = pnand %p963_p13, %p957_p10 }
  0x20   :  { %967 = shalt.err (!%p964_p0)
}
  0x21   :  { %s999_s1 = smov 768   ;;  %s1000_s27 = smov 48  }
  0x22   :  { %44 = dma.hbm_to_vmem [thread:$0]  %s1061_s2, 6144, %s39_s25, [#allocation6], %s999_s1, %s999_s1, %s1000_s27  }
  0x23   :  { %988 = dma.done.wait [#allocation3], 1024  }
  0x24   :  { %989 = vsyncadd [#allocation3], 4294966272 }
  0x25   :  { %990 = dma.done.wait [#allocation6], 6208  }
  0x26   :  { %991 = vsyncadd [#allocation6], 4294961088  ;;  %v1001_v0 = vmov 0.0   ;;  %vm1002_vm0 = vmmov 0   ;;  %v57_v1 = vld [vmem:[#allocation2 + $0x10] sm:$0xff]  ;;  %v58_v2 = vld [vmem:[#allocation2 + $0x18] sm:$0xff] }
  0x27   :  { %807 = vmatprep.subr.bf16.mxu0 %v1001_v0  ;;  %815 = vmatprep.subr.bf16.mxu1 %v1001_v0  ;;  %v61_v3 = vld [vmem:[#allocation2 + $0x30] sm:$0xff]  ;;  %v64_v4 = vpack.c.bf16 %v58_v2, %v57_v1  ;;  %v62_v5 = vld [vmem:[#allocation2 + $0x38] sm:$0xff]  ;;  %v55_v6 = vld [vmem:[#allocation2] sm:$0xff]  ;;  %vm68_vm1 = vcmask 261120   ;;  %v1003_v32 = vmov 0   ;;  %vm441_vm2 = vcmask 523264  }
  0x28   :  { %811 = vmatprep.mubr.msk.bf16.mxu0 %vm1002_vm0, %v1001_v0  ;;  %819 = vmatprep.mubr.msk.bf16.mxu1 %vm1002_vm0, %v1001_v0  ;;  %v56_v7 = vld [vmem:[#allocation2 + $0x8] sm:$0xff]  ;;  %v66_v8 = vpack.c.bf16 %v62_v5, %v61_v3  ;;  %v59_v9 = vld [vmem:[#allocation2 + $0x20] sm:$0xff]  ;;  %s1004_s0 = smov [#allocation8]  }
  0x29   :  { %v60_v10 = vld [vmem:[#allocation2 + $0x28] sm:$0xff]  ;;  %808 = vmatpush3.bf16.msra.mxu0 %v64_v4  ;;  %v63_v11 = vpack.c.bf16 %v56_v7, %v55_v6  ;;  %v841_v14 = vld [vmem:[#allocation7 + $0x12c] ss:$48 sps:$4 sm:$0xff]   ;;  %v836_v16 = vld [vmem:[#allocation7 + $0x120] ss:$48 sps:$4 sm:$0xff]   ;;  %s732_s2 = sshll.u32 %s1004_s0, 4  ;;  %s733_s2 = int_to_ptr.vmem [resolvable:$true] %s732_s2 }
  0x2a   :  { %816 = vmatpush3.bf16.msra.mxu1 %v66_v8  ;;  %809 = vmatprep.subr.bf16.mxu0 %v1001_v0  ;;  %v65_v12 = vpack.c.bf16 %v60_v10, %v59_v9  ;;  %v838_v13 = vld [vmem:[#allocation7 + $0x124] ss:$48 sps:$4 sm:$0xff]   ;;  %v67_v15 = vld [vmem:[#allocation5] sm:$0xf]  ;;  %v839_v17 = vld [vmem:[#allocation7 + $0x128] ss:$48 sps:$4 sm:$0xff]   ;;  %p973_p2 = scmp.lt.s32.totalorder %s733_s2, %s733_s2 }
  0x2b   :  { %817 = vmatprep.subr.bf16.mxu1 %v1001_v0  ;;  %v844_v18 = vld [vmem:[#allocation7 + $0xc4] ss:$48 sps:$4 sm:$0xff]   ;;  %v847_v19 = vld [vmem:[#allocation7 + $0xcc] ss:$48 sps:$4 sm:$0xff]   ;;  %v842_v20 = vld [vmem:[#allocation7 + $0xc0] ss:$48 sps:$4 sm:$0xff]  }
  0x2c   :  { %v845_v21 = vld [vmem:[#allocation7 + $0xc8] ss:$48 sps:$4 sm:$0xff]   ;;  %v850_v22 = vld [vmem:[#allocation7 + $0x64] ss:$48 sps:$4 sm:$0xff]   ;;  %v848_v23 = vld [vmem:[#allocation7 + $0x60] ss:$48 sps:$4 sm:$0xff]  }
  0x2d   :  { %810 = vmatpush3.bf16.msra.mxu0 %v63_v11  ;;  %v853_v24 = vld [vmem:[#allocation7 + $0x6c] ss:$48 sps:$4 sm:$0xff]   ;;  %v851_v25 = vld [vmem:[#allocation7 + $0x68] ss:$48 sps:$4 sm:$0xff]   ;;  %v856_v26 = vld [vmem:[#allocation7 + $0x4] ss:$48 sps:$4 sm:$0xff]  }
  0x2e   :  { %818 = vmatpush3.bf16.msra.mxu1 %v65_v12  ;;  %453 = vmatprep.subr.bf16.mxu0 %v838_v13  ;;  %v859_v27 = vld [vmem:[#allocation7 + $0xc] ss:$48 sps:$4 sm:$0xff]   ;;  %v854_v28 = vld [vmem:[#allocation7] ss:$48 sps:$4 sm:$0xff]   ;;  %v857_v29 = vld [vmem:[#allocation7 + $0x8] ss:$48 sps:$4 sm:$0xff]  }
  0x2f   :  { %496 = vmatprep.subr.bf16.mxu1 %v841_v14  ;;  %v862_v30 = vld [vmem:[#allocation7 + $0x134] ss:$48 sps:$4 sm:$0xff]   ;;  %v865_v31 = vld [vmem:[#allocation7 + $0x13c] ss:$48 sps:$4 sm:$0xff]   ;;  %v860_v35 = vld [vmem:[#allocation7 + $0x130] ss:$48 sps:$4 sm:$0xff]  }
  0x30   :  { %812 = vmatmul.mubr.msk.bf16.vlgmr.msra.gmra.mxu0 %vm68_vm1, %v67_v15  ;;  %v863_v36 = vld [vmem:[#allocation7 + $0x138] ss:$48 sps:$4 sm:$0xff]   ;;  %v868_v39 = vld [vmem:[#allocation7 + $0xd4] ss:$48 sps:$4 sm:$0xff]   ;;  %v871_v40 = vld [vmem:[#allocation7 + $0xdc] ss:$48 sps:$4 sm:$0xff]  }
  0x31   :  { %820 = vmatmul.mubr.msk.bf16.vlgmr.msra.gmra.mxu1 %vm68_vm1, %v67_v15  ;;  %454 = vmatpush1.bf16.msra.mxu0 %v836_v16  ;;  %v866_v44 = vld [vmem:[#allocation7 + $0xd0] ss:$48 sps:$4 sm:$0xff]   ;;  %v869_v45 = vld [vmem:[#allocation7 + $0xd8] ss:$48 sps:$4 sm:$0xff]   ;;  %v874_v47 = vld [vmem:[#allocation7 + $0x74] ss:$48 sps:$4 sm:$0xff]  }
  0x32   :  { %497 = vmatpush1.bf16.msra.mxu1 %v839_v17  ;;  %455 = vmatprep.subr.bf16.mxu0 %v844_v18  ;;  %v877_v48 = vld [vmem:[#allocation7 + $0x7c] ss:$48 sps:$4 sm:$0xff]   ;;  %v872_v50 = vld [vmem:[#allocation7 + $0x70] ss:$48 sps:$4 sm:$0xff]   ;;  %v875_v51 = vld [vmem:[#allocation7 + $0x78] ss:$48 sps:$4 sm:$0xff]  }
  0x33   :  { %498 = vmatprep.subr.bf16.mxu1 %v847_v19  ;;  %477 = vmatprep.mubr.bf16.mxu0 %v1003_v32  ;;  %v880_v52 = vld [vmem:[#allocation7 + $0x14] ss:$48 sps:$4 sm:$0xff]   ;;  %v883_v53 = vld [vmem:[#allocation7 + $0x1c] ss:$48 sps:$4 sm:$0xff]   ;;  %v878_v54 = vld [vmem:[#allocation7 + $0x10] ss:$48 sps:$4 sm:$0xff]  }
  0x34   :  { %520 = vmatprep.mubr.bf16.mxu1 %v1003_v32  ;;  %v881_v55 = vld [vmem:[#allocation7 + $0x18] ss:$48 sps:$4 sm:$0xff]   ;;  %v886_v56 = vld [vmem:[#allocation7 + $0x144] ss:$48 sps:$4 sm:$0xff]   ;;  %v889_v57 = vld [vmem:[#allocation7 + $0x14c] ss:$48 sps:$4 sm:$0xff]  }
  0x35   :  { %456 = vmatpush1.bf16.msra.mxu0 %v842_v20  ;;  %v884_v58 = vld [vmem:[#allocation7 + $0x140] ss:$48 sps:$4 sm:$0xff]   ;;  %v887_v59 = vld [vmem:[#allocation7 + $0x148] ss:$48 sps:$4 sm:$0xff]   ;;  %v892_v60 = vld [vmem:[#allocation7 + $0xe4] ss:$48 sps:$4 sm:$0xff]  }
  0x36   :  { %499 = vmatpush1.bf16.msra.mxu1 %v845_v21  ;;  %457 = vmatprep.subr.bf16.mxu0 %v850_v22  ;;  %v895_v61 = vld [vmem:[#allocation7 + $0xec] ss:$48 sps:$4 sm:$0xff]   ;;  %v890_v62 = vld [vmem:[#allocation7 + $0xe0] ss:$48 sps:$4 sm:$0xff]   ;;  %v893_v63 = vld [vmem:[#allocation7 + $0xe8] ss:$48 sps:$4 sm:$0xff]  }
  0x37   :  { %500 = vmatprep.subr.bf16.mxu1 %v853_v24  ;;  %v898_v0 = vld [vmem:[#allocation7 + $0x84] ss:$48 sps:$4 sm:$0xff]   ;;  %v901_v1 = vld [vmem:[#allocation7 + $0x8c] ss:$48 sps:$4 sm:$0xff]   ;;  %v896_v2 = vld [vmem:[#allocation7 + $0x80] ss:$48 sps:$4 sm:$0xff]  }
  0x38   :  { %v899_v3 = vld [vmem:[#allocation7 + $0x88] ss:$48 sps:$4 sm:$0xff]   ;;  %v904_v4 = vld [vmem:[#allocation7 + $0x24] ss:$48 sps:$4 sm:$0xff]   ;;  %v907_v5 = vld [vmem:[#allocation7 + $0x2c] ss:$48 sps:$4 sm:$0xff]  }
  0x39   :  { %458 = vmatpush1.bf16.msra.mxu0 %v848_v23  ;;  %v902_v6 = vld [vmem:[#allocation7 + $0x20] ss:$48 sps:$4 sm:$0xff]   ;;  %v905_v7 = vld [vmem:[#allocation7 + $0x28] ss:$48 sps:$4 sm:$0xff]   ;;  %s968_s30 = scalar_lea.vmem %s733_s2, 3072 }
  0x3a   :  { %501 = vmatpush1.bf16.msra.mxu1 %v851_v25  ;;  %459 = vmatprep.subr.bf16.mxu0 %v856_v26  ;;  %p969_p1 = scmp.ne.s32.totalorder %s733_s2, %s968_s30  ;;  %p974_p3 = scmp.lt.s32.totalorder %s968_s30, %s968_s30 }
  0x3b   :  { %502 = vmatprep.subr.bf16.mxu1 %v859_v27 }
  0x3c   :  { %p975_p4 = por %p974_p3, %p973_p2 }
  0x3d   :  { %460 = vmatpush1.bf16.msra.mxu0 %v854_v28 }
  0x3e   :  { %503 = vmatpush1.bf16.msra.mxu1 %v857_v29  ;;  %539 = vmatprep.subr.bf16.mxu0 %v862_v30  ;;  %p976_p5 = pnand %p975_p4, %p969_p1 }
  0x3f   :  { %582 = vmatprep.subr.bf16.mxu1 %v865_v31 }
  0xf0   :  { %v106_v33 = vpop.f32.mrf.mxu0 }
  0xf1   :  { %v146_v34 = vpop.f32.mrf.mxu1 }
  0xf2   :  { %v1038_v37 = vpack.c.bf16 %v146_v34, %v106_v33  ;;  %v813_v38 = vpop.f32.mrf.mxu0 }
  0xf3   :  { %v821_v41 = vpop.f32.mrf.mxu1 }
  0xf4   :  { %795 = vmatmul.mubr.msk.bf16.vlgmr.msra.gmra.mxu0 %vm441_vm2, %v1038_v37  ;;  %796 = vmatmul.mubr.msk.bf16.vlgmr.msra.gmra.mxu1 %vm441_vm2, %v1038_v37  ;;  %v109_v42 = vpop.f32.mrf.mxu0 }
  0xf5   :  { %540 = vmatpush1.bf16.msra.mxu0 %v860_v35  ;;  %583 = vmatpush1.bf16.msra.mxu1 %v863_v36  ;;  %v149_v43 = vpop.f32.mrf.mxu1 }
  0xf6   :  { %v814_v46 = vpop.f32.mrf.mxu0  ;;  %541 = vmatprep.subr.bf16.mxu0 %v868_v39  ;;  %584 = vmatprep.subr.bf16.mxu1 %v871_v40 }
  0xf7   :  { %v822_v49 = vpop.f32.mrf.mxu1  ;;  %563 = vmatprep.mubr.bf16.mxu0 %v1003_v32  ;;  %606 = vmatprep.mubr.bf16.mxu1 %v1003_v32 }
  0xf9   :  { %542 = vmatpush1.bf16.msra.mxu0 %v866_v44  ;;  %585 = vmatpush1.bf16.msra.mxu1 %v869_v45 }
  0xfa   :  { %543 = vmatprep.subr.bf16.mxu0 %v874_v47  ;;  %586 = vmatprep.subr.bf16.mxu1 %v877_v48 }
  0xfd   :  { %544 = vmatpush1.bf16.msra.mxu0 %v872_v50  ;;  %587 = vmatpush1.bf16.msra.mxu1 %v875_v51 }
  0xfe   :  { %545 = vmatprep.subr.bf16.mxu0 %v880_v52  ;;  %588 = vmatprep.subr.bf16.mxu1 %v883_v53 }
 0x101   :  { %546 = vmatpush1.bf16.msra.mxu0 %v878_v54  ;;  %589 = vmatpush1.bf16.msra.mxu1 %v881_v55 }
 0x102   :  { %625 = vmatprep.subr.bf16.mxu0 %v886_v56  ;;  %668 = vmatprep.subr.bf16.mxu1 %v889_v57 }
 0x104   :  { %797 = vmatmul.mubr.msk.bf16.vlgmr.msra.gmra.mxu0 %vm441_vm2, %v1038_v37  ;;  %798 = vmatmul.mubr.msk.bf16.vlgmr.msra.gmra.mxu1 %vm441_vm2, %v1038_v37 }
 0x105   :  { %626 = vmatpush1.bf16.msra.mxu0 %v884_v58  ;;  %669 = vmatpush1.bf16.msra.mxu1 %v887_v59 }
 0x106   :  { %627 = vmatprep.subr.bf16.mxu0 %v892_v60  ;;  %670 = vmatprep.subr.bf16.mxu1 %v895_v61 }
 0x107   :  { %649 = vmatprep.mubr.bf16.mxu0 %v1003_v32  ;;  %692 = vmatprep.mubr.bf16.mxu1 %v1003_v32 }
 0x109   :  { %628 = vmatpush1.bf16.msra.mxu0 %v890_v62  ;;  %671 = vmatpush1.bf16.msra.mxu1 %v893_v63 }
 0x10a   :  { %629 = vmatprep.subr.bf16.mxu0 %v898_v0  ;;  %672 = vmatprep.subr.bf16.mxu1 %v901_v1 }
 0x10d   :  { %630 = vmatpush1.bf16.msra.mxu0 %v896_v2  ;;  %673 = vmatpush1.bf16.msra.mxu1 %v899_v3 }
 0x10e   :  { %631 = vmatprep.subr.bf16.mxu0 %v904_v4  ;;  %674 = vmatprep.subr.bf16.mxu1 %v907_v5 }
 0x111   :  { %632 = vmatpush1.bf16.msra.mxu0 %v902_v6  ;;  %675 = vmatpush1.bf16.msra.mxu1 %v905_v7 }
 0x114   :  { %799 = vmatmul.mubr.msk.bf16.vlgmr.msra.gmra.mxu0 %vm441_vm2, %v1038_v37  ;;  %800 = vmatmul.mubr.msk.bf16.vlgmr.msra.gmra.mxu1 %vm441_vm2, %v1038_v37 }
 0x1b4   :  { %v479_v8 = vpop.f32.mrf.mxu0  ;;  %v522_v9 = vpop.f32.mrf.mxu1 }
 0x1b5   :  { %703 = vst [vmem:[#allocation8] sm:$0xff] %v479_v8  ;;  %705 = vst [vmem:[#allocation8 + $0x10] sm:$0xff] %v522_v9 }
 0x1b6   :  { %v481_v10 = vpop.f32.mrf.mxu0  ;;  %v524_v11 = vpop.f32.mrf.mxu1 }
 0x1b7   :  { %704 = vst [vmem:[#allocation8 + $0x8] sm:$0xff] %v481_v10  ;;  %706 = vst [vmem:[#allocation8 + $0x18] sm:$0xff] %v524_v11 }
 0x1b8   :  { %v483_v12 = vpop.f32.mrf.mxu0  ;;  %v526_v13 = vpop.f32.mrf.mxu1 }
 0x1b9   :  { %715 = vst [vmem:[#allocation8 + $0x60] sm:$0xff] %v483_v12  ;;  %717 = vst [vmem:[#allocation8 + $0x70] sm:$0xff] %v526_v13 }
 0x1ba   :  { %v485_v14 = vpop.f32.mrf.mxu0  ;;  %v528_v15 = vpop.f32.mrf.mxu1 }
 0x1bb   :  { %716 = vst [vmem:[#allocation8 + $0x68] sm:$0xff] %v485_v14  ;;  %718 = vst [vmem:[#allocation8 + $0x78] sm:$0xff] %v528_v15 }
 0x1c4   :  { %v565_v16 = vpop.f32.mrf.mxu0  ;;  %v608_v17 = vpop.f32.mrf.mxu1 }
 0x1c5   :  { %707 = vst [vmem:[#allocation8 + $0x20] sm:$0xff] %v565_v16  ;;  %709 = vst [vmem:[#allocation8 + $0x30] sm:$0xff] %v608_v17 }
 0x1c6   :  { %v567_v18 = vpop.f32.mrf.mxu0  ;;  %v610_v19 = vpop.f32.mrf.mxu1 }
 0x1c7   :  { %708 = vst [vmem:[#allocation8 + $0x28] sm:$0xff] %v567_v18  ;;  %710 = vst [vmem:[#allocation8 + $0x38] sm:$0xff] %v610_v19 }
 0x1c8   :  { %v569_v20 = vpop.f32.mrf.mxu0  ;;  %v612_v21 = vpop.f32.mrf.mxu1 }
 0x1c9   :  { %719 = vst [vmem:[#allocation8 + $0x80] sm:$0xff] %v569_v20  ;;  %721 = vst [vmem:[#allocation8 + $0x90] sm:$0xff] %v612_v21 }
 0x1ca   :  { %v571_v22 = vpop.f32.mrf.mxu0  ;;  %v614_v23 = vpop.f32.mrf.mxu1 }
 0x1cb   :  { %720 = vst [vmem:[#allocation8 + $0x88] sm:$0xff] %v571_v22  ;;  %722 = vst [vmem:[#allocation8 + $0x98] sm:$0xff] %v614_v23 }
 0x1d4   :  { %v651_v24 = vpop.f32.mrf.mxu0  ;;  %v694_v25 = vpop.f32.mrf.mxu1 }
 0x1d5   :  { %711 = vst [vmem:[#allocation8 + $0x40] sm:$0xff] %v651_v24  ;;  %713 = vst [vmem:[#allocation8 + $0x50] sm:$0xff] %v694_v25 }
 0x1d6   :  { %v653_v26 = vpop.f32.mrf.mxu0  ;;  %v696_v27 = vpop.f32.mrf.mxu1 }
 0x1d7   :  { %712 = vst [vmem:[#allocation8 + $0x48] sm:$0xff] %v653_v26  ;;  %714 = vst [vmem:[#allocation8 + $0x58] sm:$0xff] %v696_v27 }
 0x1d8   :  { %v655_v28 = vpop.f32.mrf.mxu0  ;;  %v698_v29 = vpop.f32.mrf.mxu1 }
 0x1d9   :  { %723 = vst [vmem:[#allocation8 + $0xa0] sm:$0xff] %v655_v28  ;;  %725 = vst [vmem:[#allocation8 + $0xb0] sm:$0xff] %v698_v29 }
 0x1da   :  { %v657_v30 = vpop.f32.mrf.mxu0  ;;  %v700_v31 = vpop.f32.mrf.mxu1 }
 0x1db   :  { %724 = vst [vmem:[#allocation8 + $0xa8] sm:$0xff] %v657_v30  ;;  %726 = vst [vmem:[#allocation8 + $0xb8] sm:$0xff] %v700_v31 }
 0x1dc   :  { %979 = shalt.err (!%p976_p5)
}
 0x1dd   :  { %s1005_s4 = smov 1536   ;;  %s1006_s5 = smov 96  }
 0x1de   :  { %738 = dma.vmem_to_hbm [thread:$0]  %s733_s2, 3072, %s1062_s3, [#allocation4], %s1005_s4, %s1005_s4, %s1006_s5  }
 0x1df   :  { %992 = dma.done.wait [#allocation4], 3072  }
 0x1e0   :  { %993 = vsyncadd [#allocation4], 4294964224 }
 0x1e1   :  { %742 = vsyncpa [#allocation3], 1 }
 0x1e2   :  { %743 = vsyncpa [#allocation6], 1 }
 0x1e3   :  { %744 = vsyncpa [#allocation4], 1 }

</bundles_post_ra>
